<compile_context>
chip_gen: v7x
topology: tpu7x:2x2x1
jax: 0.10.0
libtpu: 0.0.40
codegen_flags: <defaults>
</compile_context>

<pallas_src>
import functools

import numpy as np
import jax
import jax.numpy as jnp
from jax import lax
from jax.experimental import pallas as pl
from jax.experimental.pallas import tpu as pltpu


# ----------------------------------------------------------------------------
# One-time (init) parameter packing -- NOT in the per-call hot path.
# ----------------------------------------------------------------------------
def pack_deconv_params(weight, bias, *, batch, stride, padding, output_size, input_hw):
    """Build the fused sub-pixel matmul weights (bias folded in) on the host, once.

    weight : (CIN, COUT, K, K)   PyTorch ConvTranspose2d layout
    bias   : (COUT,)
    Returns a jnp.float32 array of shape (N*Q, 4*N*CIN + 8), Q = stride*stride*COUT.
    Row order  : (n, r, c, co)        -- matches the kernel's output rows.
    Col order  : (dd = dj*2+di, m, ci) for the 4*N*CIN tap columns, then 8 bias cols.
    """
    weight = np.asarray(weight, dtype=np.float32)
    bias = np.asarray(bias, dtype=np.float32)
    CIN, COUT, K, K2 = weight.shape
    assert K == K2
    N = batch
    s = stride
    H, W = input_hw
    OH, OW = output_size

    # Kernel targets the MyConvTranspose2d use-case: output_size == stride * input.
    assert OH == s * H and OW == s * W, "kernel assumes output_size == stride * input size"
    op = OH - ((H - 1) * s - 2 * padding + K)    # implied output_padding
    assert 0 <= op < s, "invalid output_size"

    # Sub-pixel tap map: output oh = j*s + r draws from input ih = j + d with
    # kernel tap kh = r + padding - d*s (kept when 0 <= kh < K).
    def taps(phase):
        out = []
        for d in (0, 1):
            k = phase + padding - d * s
            if 0 <= k < K:
                out.append((d, k))
        return out

    # The kernel's shift budget is (dj, di) in {0,1}^2 -- nothing may fall outside.
    for phase in range(s):
        for d in (-1, 2):
            k = phase + padding - d * s
            assert not (0 <= k < K), "tap outside the (dj,di) in {0,1} shift budget"

    # V[r, c, dj, di, ci, co]: coeff of x[n,ci,j+dj,i+di] in y[n,co,s*j+r,s*i+c].
    V = np.zeros((s, s, 2, 2, CIN, COUT), dtype=np.float32)
    for r in range(s):
        for dj, kh in taps(r):
            for c in range(s):
                for di, kw_tap in taps(c):
                    V[r, c, dj, di] = weight[:, :, kh, kw_tap]

    Q = s * s * COUT
    Wq = V.transpose(0, 1, 5, 2, 3, 4).reshape(Q, 4, CIN)   # (q=(r,c,co), dd, ci)

    KT = 4 * N * CIN + 8                                    # + 8 ones rows for bias
    w_big = np.zeros((N * Q, KT), dtype=np.float32)
    # Block-diagonal over batch so N is folded into a single matmul.
    for n in range(N):
        for dd in range(4):
            w_big[n * Q:(n + 1) * Q,
                  dd * N * CIN + n * CIN: dd * N * CIN + (n + 1) * CIN] = Wq[:, dd, :]
    # Fold bias: the kernel appends an 8-row ones plane; bias rides on its first row.
    w_big[:, 4 * N * CIN] = np.tile(bias, N * s * s)
    return jnp.asarray(w_big)


# ----------------------------------------------------------------------------
# Pallas kernel
# ----------------------------------------------------------------------------
def _deconv_subpixel_kernel(x_ref, w_ref, o_ref, t_ref, *, H, W, N, CIN):
    """Sub-pixel transposed conv, single grid step, bias folded into the matmul.

    x_ref: (N*CIN, H*W)        input, NCHW viewed 2-D (lane-dense, H*W on lanes)
    w_ref: (N*Q, 4*N*CIN + 8)  fused weights (taps + channels + batch + bias)
    o_ref: (N*Q, H*W)          output rows (n, r, c, co); lanes j*W + i
    t_ref: VMEM scratch (4*N*CIN + 8, H*W) for the stacked shifted planes + ones
    """
    x = x_ref[...]                                   # (N*CIN, P)
    P = H * W
    R = N * CIN                                      # rows per shifted plane (8)

    # Validity masks for the +1 row / +1 column shifts (zero beyond the border).
    lane = lax.broadcasted_iota(jnp.int32, x.shape, 1)
    ok_w = (lane % W) < (W - 1)                      # column i+1 exists
    ok_h = lane < (H - 1) * W                        # row j+1 exists
    zero = jnp.zeros_like(x)

    # Shifted planes x[n,ci,j+dj,i+di]; circular lane roll (XLU slot) + border masks.
    x01 = jnp.where(ok_w, pltpu.roll(x, P - 1, axis=1), zero)               # (0,1)
    x10 = jnp.where(ok_h, pltpu.roll(x, P - W, axis=1), zero)               # (1,0)
    x11 = jnp.where(ok_w & ok_h, pltpu.roll(x, P - W - 1, axis=1), zero)    # (1,1)

    # Tile-aligned writes into VMEM scratch (every offset is a multiple of 8 rows,
    # every plane is whole (8,128) tiles) -- no in-kernel concat materialization.
    t_ref[pl.ds(0 * R, R), :] = x
    t_ref[pl.ds(1 * R, R), :] = x01
    t_ref[pl.ds(2 * R, R), :] = x10
    t_ref[pl.ds(3 * R, R), :] = x11
    t_ref[pl.ds(4 * R, 8), :] = jnp.ones((8, P), dtype=x.dtype)   # bias ones plane

    # One fused MXU matmul: taps + channel mixing + batch block-diag + bias.
    o_ref[...] = jnp.dot(
        w_ref[...], t_ref[...], preferred_element_type=jnp.float32
    ).astype(o_ref.dtype)


# ----------------------------------------------------------------------------
# Per-call forward (jit this; weights already packed)
# ----------------------------------------------------------------------------
def my_conv_transpose2d_forward(x_nchw, w_packed, *, cout, stride, output_size):
    """Transposed 2D conv matching nn.ConvTranspose2d(x, output_size=...).

    x_nchw   : (N, CIN, H, W)
    w_packed : output of pack_deconv_params
    Returns (N, COUT, OH, OW).
    """
    N, CIN, H, W = x_nchw.shape
    s = stride
    OH, OW = output_size
    Q = s * s * cout
    KT = 4 * N * CIN + 8
    P = H * W

    # Free reshape of NCHW -> lane-dense 2-D view (no wrapper transpose, no dilation).
    x2d = x_nchw.reshape(N * CIN, P).astype(jnp.float32)

    z = pl.pallas_call(
        functools.partial(_deconv_subpixel_kernel, H=H, W=W, N=N, CIN=CIN),
        out_shape=jax.ShapeDtypeStruct((N * Q, P), jnp.float32),
        grid_spec=pltpu.PrefetchScalarGridSpec(
            num_scalar_prefetch=0,
            grid=(1,),
            in_specs=[
                pl.BlockSpec((N * CIN, P), lambda i: (0, 0)),
                pl.BlockSpec((N * Q, KT), lambda i: (0, 0)),
            ],
            out_specs=pl.BlockSpec((N * Q, P), lambda i: (0, 0)),
            scratch_shapes=[pltpu.VMEM((KT, P), jnp.float32)],
        ),
        compiler_params=pltpu.CompilerParams(dimension_semantics=("arbitrary",)),
    )(x2d, w_packed)

    # Depth-to-space: rows (n, r, c, co), lanes (j, i) -> NCHW (n, co, s*j+r, s*i+c).
    # Kept as a single fused XLA transpose (32 KB) inside the same jit: an in-kernel
    # 4x lane interleave would cost more XLU/bandwidth than the launch it saves.
    z = z.reshape(N, s, s, cout, H, W)
    y = jnp.transpose(z, (0, 3, 4, 1, 5, 2)).reshape(N, cout, OH, OW)
    return y.astype(x_nchw.dtype)


if __name__ == "__main__":
    # Deterministic synthetic parameters (no checkpoint loading).
    N, CIN, H, W = 2, 4, 16, 16
    COUT, K, STRIDE, PAD = 4, 3, 2, 1
    OUTPUT_SIZE = (32, 32)   # -> output_padding = 1

    key = jax.random.PRNGKey(0)
    kx, kw, kb = jax.random.split(key, 3)
    x = jax.random.normal(kx, (N, CIN, H, W), dtype=jnp.float32)
    weight = 0.1 * jax.random.normal(kw, (CIN, COUT, K, K), dtype=jnp.float32)
    bias = 0.1 * jax.random.normal(kb, (COUT,), dtype=jnp.float32)

    # --- init-time: pack weights once (host-side), outside the hot path ---------
    w_packed = pack_deconv_params(
        weight, bias, batch=N, stride=STRIDE, padding=PAD,
        output_size=OUTPUT_SIZE, input_hw=(H, W))

    # --- per-call: jitted forward takes (x, pre-packed weights) -----------------
    fwd = jax.jit(functools.partial(
        my_conv_transpose2d_forward, cout=COUT, stride=STRIDE, output_size=OUTPUT_SIZE))
    out = jax.block_until_ready(fwd(x, w_packed))
    assert out.shape == (N, COUT, OUTPUT_SIZE[0], OUTPUT_SIZE[1]), out.shape

    # Cross-check against XLA's dilated convolution (same math as ConvTranspose2d).
    wf = jnp.transpose(jnp.flip(weight, axis=(2, 3)), (2, 3, 0, 1))
    lo = K - 1 - PAD
    op = OUTPUT_SIZE[0] - ((H - 1) * STRIDE - 2 * PAD + K)
    ref = lax.conv_general_dilated(
        jnp.transpose(x, (0, 2, 3, 1)), wf,
        window_strides=(1, 1),
        padding=[(lo, lo + op), (lo, lo + op)],
        lhs_dilation=(STRIDE, STRIDE),
        dimension_numbers=("NHWC", "HWIO", "NHWC"),
    ) + bias
    ref = jnp.transpose(ref, (0, 3, 1, 2))
    err = float(jnp.max(jnp.abs(out - ref)))
    assert jnp.allclose(out, ref, atol=1e-3, rtol=1e-3), err

    print("KERNEL_OK")
</pallas_src>

<mosaic_0001>
module attributes {stable_mosaic.version = 11 : i64} {
  func.func @_deconv_subpixel_kernel(%arg0: i32, %arg1: memref<8x256xf32, #tpu.memory_space<vmem>>, %arg2: memref<32x40xf32, #tpu.memory_space<vmem>>, %arg3: memref<32x256xf32, #tpu.memory_space<vmem>>, %arg4: memref<40x256xf32, #tpu.memory_space<vmem>>) attributes {dimension_semantics = [#tpu.dimension_semantics<arbitrary>], iteration_bounds = array<i64: 1>, scalar_prefetch = 0 : i64, scratch_operands = 1 : i64, tpu.core_type = #tpu.core_type<tc>, window_params = [{pipeline_mode = #tpu.pipeline_mode<synchronous>, transform_indices = @transform_0, window_bounds = array<i64: 8, 256>}, {pipeline_mode = #tpu.pipeline_mode<synchronous>, transform_indices = @transform_1, window_bounds = array<i64: 32, 40>}, {pipeline_mode = #tpu.pipeline_mode<synchronous>, transform_indices = @transform_2, window_bounds = array<i64: 32, 256>}]} {
    %c0 = arith.constant 0 : index
    %c0_0 = arith.constant 0 : index
    %0 = vector.load %arg1[%c0, %c0_0] : memref<8x256xf32, #tpu.memory_space<vmem>>, vector<8x256xf32>
    %1 = tpu.iota {dimensions = array<i32: 1>} : vector<8x256xi32>
    %c16_i32 = arith.constant 16 : i32
    %c0_i32 = arith.constant 0 : i32
    %2 = arith.cmpi eq, %c16_i32, %c0_i32 : i32
    %c1_i32 = arith.constant 1 : i32
    %3 = arith.select %2, %c1_i32, %c16_i32 : i32
    %4 = vector.broadcast %3 : i32 to vector<8x256xi32>
    %5 = arith.remsi %1, %4 : vector<8x256xi32>
    %c0_i32_1 = arith.constant 0 : i32
    %6 = vector.broadcast %c0_i32_1 : i32 to vector<8x256xi32>
    %7 = arith.cmpi ne, %5, %6 : vector<8x256xi32>
    %c0_i32_2 = arith.constant 0 : i32
    %8 = vector.broadcast %c0_i32_2 : i32 to vector<8x256xi32>
    %9 = arith.cmpi slt, %5, %8 : vector<8x256xi32>
    %c0_i32_3 = arith.constant 0 : i32
    %10 = arith.cmpi slt, %3, %c0_i32_3 : i32
    %11 = vector.broadcast %10 : i1 to vector<8x256xi1>
    %12 = vector.broadcast %11 : vector<8x256xi1> to vector<8x256xi1>
    %13 = arith.xori %9, %12 : vector<8x256xi1>
    %14 = arith.andi %13, %7 : vector<8x256xi1>
    %15 = vector.broadcast %3 : i32 to vector<8x256xi32>
    %16 = arith.addi %5, %15 : vector<8x256xi32>
    %17 = arith.select %14, %16, %5 : vector<8x256xi1>, vector<8x256xi32>
    %c15_i32 = arith.constant 15 : i32
    %18 = vector.broadcast %c15_i32 : i32 to vector<8x256xi32>
    %19 = arith.cmpi slt, %17, %18 : vector<8x256xi32>
    %c240_i32 = arith.constant 240 : i32
    %20 = vector.broadcast %c240_i32 : i32 to vector<8x256xi32>
    %21 = arith.cmpi slt, %1, %20 : vector<8x256xi32>
    %cst = arith.constant 0.000000e+00 : f32
    %22 = vector.broadcast %cst : f32 to vector<8x256xf32>
    %c255_i32 = arith.constant 255 : i32
    %23 = tpu.dynamic_rotate %0 by %c255_i32 dim 1 : vector<8x256xf32>, i32 -> vector<8x256xf32>
    %24 = arith.select %19, %23, %22 : vector<8x256xi1>, vector<8x256xf32>
    %c240_i32_4 = arith.constant 240 : i32
    %25 = tpu.dynamic_rotate %0 by %c240_i32_4 dim 1 : vector<8x256xf32>, i32 -> vector<8x256xf32>
    %26 = arith.select %21, %25, %22 : vector<8x256xi1>, vector<8x256xf32>
    %27 = arith.andi %19, %21 : vector<8x256xi1>
    %c239_i32 = arith.constant 239 : i32
    %28 = tpu.dynamic_rotate %0 by %c239_i32 dim 1 : vector<8x256xf32>, i32 -> vector<8x256xf32>
    %29 = arith.select %27, %28, %22 : vector<8x256xi1>, vector<8x256xf32>
    %c0_5 = arith.constant 0 : index
    %c0_6 = arith.constant 0 : index
    %30 = vector.load %arg4[%c0_5, %c0_6] : memref<40x256xf32, #tpu.memory_space<vmem>>, vector<8x256xf32>
    tpu.vector_store %arg4[%c0_5, %c0_6], %0 {strides = array<i32>} : memref<40x256xf32, #tpu.memory_space<vmem>>, vector<8x256xf32>,
    %c8 = arith.constant 8 : index
    %c0_7 = arith.constant 0 : index
    %31 = vector.load %arg4[%c8, %c0_7] : memref<40x256xf32, #tpu.memory_space<vmem>>, vector<8x256xf32>
    tpu.vector_store %arg4[%c8, %c0_7], %24 {strides = array<i32>} : memref<40x256xf32, #tpu.memory_space<vmem>>, vector<8x256xf32>,
    %c16 = arith.constant 16 : index
    %c0_8 = arith.constant 0 : index
    %32 = vector.load %arg4[%c16, %c0_8] : memref<40x256xf32, #tpu.memory_space<vmem>>, vector<8x256xf32>
    tpu.vector_store %arg4[%c16, %c0_8], %26 {strides = array<i32>} : memref<40x256xf32, #tpu.memory_space<vmem>>, vector<8x256xf32>,
    %c24 = arith.constant 24 : index
    %c0_9 = arith.constant 0 : index
    %33 = vector.load %arg4[%c24, %c0_9] : memref<40x256xf32, #tpu.memory_space<vmem>>, vector<8x256xf32>
    tpu.vector_store %arg4[%c24, %c0_9], %29 {strides = array<i32>} : memref<40x256xf32, #tpu.memory_space<vmem>>, vector<8x256xf32>,
    %cst_10 = arith.constant 1.000000e+00 : f32
    %34 = vector.broadcast %cst_10 : f32 to vector<8x256xf32>
    %c32 = arith.constant 32 : index
    %c0_11 = arith.constant 0 : index
    %35 = vector.load %arg4[%c32, %c0_11] : memref<40x256xf32, #tpu.memory_space<vmem>>, vector<8x256xf32>
    tpu.vector_store %arg4[%c32, %c0_11], %34 {strides = array<i32>} : memref<40x256xf32, #tpu.memory_space<vmem>>, vector<8x256xf32>,
    %c0_12 = arith.constant 0 : index
    %c0_13 = arith.constant 0 : index
    %36 = vector.load %arg2[%c0_12, %c0_13] : memref<32x40xf32, #tpu.memory_space<vmem>>, vector<32x40xf32>
    %c0_14 = arith.constant 0 : index
    %c0_15 = arith.constant 0 : index
    %37 = vector.load %arg4[%c0_14, %c0_15] : memref<40x256xf32, #tpu.memory_space<vmem>>, vector<40x256xf32>
    %cst_16 = arith.constant dense<0.000000e+00> : vector<32x256xf32>
    %38 = tpu.matmul %36, %37, %cst_16 {dimension_numbers = #tpu.dot_dimension_numbers<[1], [0], [0], [1], [0, 0, 1, 1], [], []>} : vector<32x40xf32>, vector<40x256xf32>, vector<32x256xf32> -> vector<32x256xf32>
    %c0_17 = arith.constant 0 : index
    %c0_18 = arith.constant 0 : index
    %39 = vector.load %arg3[%c0_17, %c0_18] : memref<32x256xf32, #tpu.memory_space<vmem>>, vector<32x256xf32>
    tpu.vector_store %arg3[%c0_17, %c0_18], %38 {strides = array<i32>} : memref<32x256xf32, #tpu.memory_space<vmem>>, vector<32x256xf32>,
    return
  }
  func.func @transform_0(%arg0: i32) -> (i32, i32) {
    %c0_i32 = arith.constant 0 : i32
    %c0_i32_0 = arith.constant 0 : i32
    %c0_i32_1 = arith.constant 0 : i32
    return %c0_i32, %c0_i32_0 : i32, i32
  }
  func.func @transform_1(%arg0: i32) -> (i32, i32) {
    %c0_i32 = arith.constant 0 : i32
    %c0_i32_0 = arith.constant 0 : i32
    %c0_i32_1 = arith.constant 0 : i32
    return %c0_i32, %c0_i32_0 : i32, i32
  }
  func.func @transform_2(%arg0: i32) -> (i32, i32) {
    %c0_i32 = arith.constant 0 : i32
    %c0_i32_0 = arith.constant 0 : i32
    %c0_i32_1 = arith.constant 0 : i32
    return %c0_i32, %c0_i32_0 : i32, i32
  }
}

</mosaic_0001>

<bundles_post_ra>
// kernel: my_conv_transpose2d_forward.1
= control target key start
LH: loop header
LB: loop body
LE: loop exit
PB: predicated region body
PF: predicated region fallthrough
CT: control target
= control target key end

     0   :  { %s259_s13 = smov 127   ;;  %s260_s14 = smov 111   ;;  %v261_v3 = vmov 0.0   ;;  %v13_v4 = vlaneseq  ;;  %vm263_vm5 = vmmov 1   ;;  %v264_v30 = vmov 1.0   ;;  %s344_s0 = inlined_call_operand.vmem [shape: f32[8,256], index: 0, kind: input, shape index: {}]   ;;  %s345_s1 = inlined_call_operand.vmem [shape: f32[32,40], index: 1, kind: input, shape index: {}]   ;;  %s346_s2 = inlined_call_operand.vmem [shape: f32[32,256], index: 2, kind: output, shape index: {}]  }
   0x1   :  { %v11_v0 = vld [vmem:[%s344_s0] sm:$0xff]  ;;  %v12_v1 = vld [vmem:[%s344_s0 + $0x8] sm:$0xff]  ;;  %174 = vmatprep.mubr.f32.mxu0 %v261_v3  ;;  %186 = vmatprep.mubr.f32.mxu1 %v261_v3  ;;  %s262_s15 = smov 112   ;;  %vm97_vm11 = vcmask 326656   ;;  %v85_v32 = vld [vmem:[%s345_s1 + $0x10] sm:$0xff] }
   0x2   :  { %v244_v2 = vpack.i.bf16 %v12_v1, %v11_v0  ;;  %v14_v5 = vand.u32 127, %v13_v4  ;;  %v83_v31 = vld [vmem:[%s345_s1] sm:$0xff]  ;;  %v84_v33 = vld [vmem:[%s345_s1 + $0x8] sm:$0xff]  ;;  %v86_v34 = vld [vmem:[%s345_s1 + $0x18] sm:$0xff] }
   0x4   :  { %245 = vrot.lane.b32.xlu0 %v244_v2, %s259_s13  ;;  %255 = vrot.lane.b32.xlu1 %v244_v2, %s260_s14  ;;  %v15_v6 = vadd.s32 128, %v14_v5  ;;  %v20_v7 = vand.u32 15, %v14_v5  ;;  %vm48_vm3 = vcmp.lt.s32.totalorder %v14_v5, 127  ;;  %vm68_vm4 = vcmp.lt.s32.totalorder %v14_v5, 111 }
   0x5   :  { %vm57_vm8 = vcmp.lt.s32.totalorder %v14_v5, 112 }
   0x6   :  { %v27_v8 = vand.u32 15, %v15_v6  ;;  %vm40_vm0 = vcmp.lt.s32.totalorder %v20_v7, 15  ;;  %vm43_vm2 = vcmp.lt.s32.totalorder %v15_v6, 240 }
   0x7   :  { %vm290_vm6 = vmpackc.low %vm40_vm0, %vm263_vm5 }
   0x8   :  { %250 = vrot.lane.b32.xlu0 %v244_v2, %s262_s15  ;;  %vm286_vm1 = vcmp.lt.s32.totalorder %v27_v8, 15 }
   0x9   :  { %vm221_vm7 = vmpackc.low %vm286_vm1, %vm263_vm5 }
   0xa   :  { %vm63_vm9 = vmand %vm286_vm1, %vm43_vm2 }
   0xb   :  { %vm227_vm10 = vmpackc.low %vm63_vm9, %vm43_vm2 }
  0x76   :  { %v246_v9 = vpop.permute.xlu0 %245  ;;  %v256_v10 = vpop.permute.xlu1 %255 }
  0x77   :  { %v248_v12 = vunpack.i.h.bf16 %v246_v9  ;;  %v247_v13 = vunpack.i.l.bf16 %v246_v9  ;;  %v258_v14 = vunpack.i.h.bf16 %v256_v10  ;;  %v257_v15 = vunpack.i.l.bf16 %v256_v10 }
  0x79   :  { %v50_v17 = vsel %vm48_vm3, %v248_v12, %v247_v13  ;;  %v49_v18 = vsel %vm48_vm3, %v247_v13, %v248_v12  ;;  %v69_v22 = vsel %vm68_vm4, %v257_v15, %v258_v14  ;;  %v70_v23 = vsel %vm68_vm4, %v258_v14, %v257_v15 }
  0x7a   :  { %v251_v19 = vpop.permute.xlu0 %250  ;;  %v220_v20 = vpack.c.bf16 %v50_v17, %v12_v1  ;;  %v223_v21 = vpack.c.bf16 %v49_v18, %v11_v0 }
  0x7b   :  { %v253_v24 = vunpack.i.h.bf16 %v251_v19  ;;  %v252_v25 = vunpack.i.l.bf16 %v251_v19 }
  0x7c   :  { %222 = vmatprep.subr.msk.bf16.mxu0 %vm221_vm7, %v220_v20  ;;  %232 = vmatprep.subr.msk.bf16.mxu1 %vm221_vm7, %v220_v20 }
  0x7d   :  { %v58_v26 = vsel %vm57_vm8, %v252_v25, %v253_v24  ;;  %v59_v27 = vsel %vm57_vm8, %v253_v24, %v252_v25  ;;  %225 = vmatpush1.bf16.msk.msra.mxu0 %vm290_vm6, %v223_v21  ;;  %235 = vmatpush1.bf16.msk.msra.mxu1 %vm290_vm6, %v223_v21 }
  0x7e   :  { %v226_v28 = vpack.c.bf16 %v70_v23, %v59_v27  ;;  %v229_v29 = vpack.c.bf16 %v69_v22, %v58_v26 }
  0x80   :  { %228 = vmatprep.subr.msk.bf16.mxu0 %vm227_vm10, %v226_v28  ;;  %233 = vmatprep.subr.msk.bf16.mxu1 %vm227_vm10, %v226_v28 }
  0x81   :  { %231 = vmatpush1.bf16.msk.msra.mxu0 %vm290_vm6, %v229_v29  ;;  %236 = vmatpush1.bf16.msk.msra.mxu1 %vm290_vm6, %v229_v29 }
  0x82   :  { %118 = vmatprep.subr.mxu0 %v264_v30  ;;  %234 = vmatprep.subr.mxu1 %v264_v30 }
  0x85   :  { %119 = vmatpush1.msra.mxu0 %v264_v30  ;;  %237 = vmatpush1.msra.mxu1 %v264_v30 }
  0x86   :  { %211 = vmatmul.mubr.msk.f32.vlgmr.msra.gmra.mrb[0].mxu0 %vm97_vm11, %v83_v31  ;;  %213 = vmatmul.mubr.msk.f32.vlgmr.msra.gmra.mrb[0].mxu1 %vm97_vm11, %v85_v32 }
  0x87   :  { %180 = vmatprep.mubr.f32.mxu0 %v261_v3  ;;  %192 = vmatprep.mubr.f32.mxu1 %v261_v3 }
  0x8a   :  { %212 = vmatmul.mubr.msk.f32.gmra.mrb[2].mxu0 %vm97_vm11, %v84_v33  ;;  %214 = vmatmul.mubr.msk.f32.gmra.mrb[2].mxu1 %vm97_vm11, %v86_v34 }
 0x159   :  { %v176_v35 = vpop.f32.mrb[0].mxu0  ;;  %v188_v36 = vpop.f32.mrb[0].mxu1 }
 0x15a   :  { %199 = vst [vmem:[%s346_s2] sm:$0xff] %v176_v35  ;;  %203 = vst [vmem:[%s346_s2 + $0x20] sm:$0xff] %v188_v36  ;;  %v178_v37 = vpop.f32.mrb[1].mxu0  ;;  %v190_v38 = vpop.f32.mrb[1].mxu1 }
 0x15b   :  { %200 = vst [vmem:[%s346_s2 + $0x8] sm:$0xff] %v178_v37  ;;  %204 = vst [vmem:[%s346_s2 + $0x28] sm:$0xff] %v190_v38 }
 0x15d   :  { %v182_v39 = vpop.f32.mrb[2].mxu0  ;;  %v194_v40 = vpop.f32.mrb[2].mxu1 }
 0x15e   :  { %201 = vst [vmem:[%s346_s2 + $0x10] sm:$0xff] %v182_v39  ;;  %205 = vst [vmem:[%s346_s2 + $0x30] sm:$0xff] %v194_v40  ;;  %v184_v41 = vpop.f32.mrb[3].mxu0  ;;  %v196_v42 = vpop.f32.mrb[3].mxu1 }
 0x15f   :  { %202 = vst [vmem:[%s346_s2 + $0x18] sm:$0xff] %v184_v41  ;;  %206 = vst [vmem:[%s346_s2 + $0x38] sm:$0xff] %v196_v42 }

</bundles_post_ra>
